<compile_context>
chip_gen: v5e
topology: v5e:2x2
jax: 0.10.0
libtpu: 0.0.40
codegen_flags: <defaults>
</compile_context>

<pallas_src>
import functools

import jax
import jax.numpy as jnp
from jax import lax
from jax.experimental import pallas as pl
from jax.experimental.pallas import tpu as pltpu

LANE = 128
SUBLANE = 8


def _round_up(n, m):
    return ((n + m - 1) // m) * m


# ----------------------------------------------------------------------------
# Pallas kernel
# ----------------------------------------------------------------------------
def _make_stage_kernel(num_layers: int, T: int, F_pad: int, C_pad: int):
    dilations = [2 ** i for i in range(num_layers)]
    dmax = max(dilations)
    left = _round_up(dmax, SUBLANE)            # sublane-aligned centre offset
    halo_rows = _round_up(left + T + dmax, SUBLANE)

    def kernel(x_ref, mask_ref, w_in_ref, b_in_ref,
               w_dil_ref, b_dil_ref, w_res_ref, b_res_ref,
               w_out_ref, b_out_ref, o_ref, halo_ref):
        x = x_ref[0].astype(jnp.bfloat16)            # (T, dim)
        mask = mask_ref[0].astype(jnp.float32)       # (T, 1)
        # Hoisted broadcasts (JAX does not CSE broadcast_in_dim).
        mask_f = jnp.broadcast_to(mask, (T, F_pad))
        mask_c = jnp.broadcast_to(mask, (T, C_pad))

        # input 1x1 conv:  out = x @ W_in + b_in   -> (T, F_pad), f32 accum
        out = (jnp.dot(x, w_in_ref[...], preferred_element_type=jnp.float32)
               + b_in_ref[...])

        # Zero the halos once per invocation; the centre is rewritten each
        # layer and never touches the halo rows.  (Per-step, not program_id==0
        # gated: under "parallel" megacore sharding each core has its own
        # scratch and may never see step 0.)
        halo_ref[0:left, :] = jnp.zeros((left, F_pad), jnp.float32)
        halo_ref[left + T:halo_rows, :] = jnp.zeros(
            (halo_rows - left - T, F_pad), jnp.float32)

        # Dilated residual layers (static unrolled loop, dilations static).
        for l, d in enumerate(dilations):
            out_b = out.astype(jnp.bfloat16)
            halo_ref[left:left + T, :] = out         # aligned centre write
            # Shifted taps are plain static slices of the halo scratch; the
            # halo zeros reproduce the conv's zero padding (also correct when
            # d >= T).  Fused operand: (T, 3*F_pad) bf16, one K = 3*F_pad MXU
            # pass instead of three K = F_pad passes.
            x3 = jnp.concatenate(
                [halo_ref[left - d:left - d + T, :].astype(jnp.bfloat16),
                 out_b,
                 halo_ref[left + d:left + d + T, :].astype(jnp.bfloat16)],
                axis=1)
            h = (jnp.dot(x3, w_dil_ref[l],
                         preferred_element_type=jnp.float32) + b_dil_ref[l])
            h = jnp.maximum(h, 0.0)                  # ReLU
            h = (jnp.dot(h.astype(jnp.bfloat16), w_res_ref[l],
                         preferred_element_type=jnp.float32) + b_res_ref[l])
            # TODO(synk): nn.Dropout is identity in eval mode; training-time
            # stochastic dropout is not implemented here.
            out = (out + h) * mask_f

        # output 1x1 conv + mask (lane-dense C_pad store)
        y = (jnp.dot(out.astype(jnp.bfloat16), w_out_ref[...],
                     preferred_element_type=jnp.float32) + b_out_ref[...])
        o_ref[0] = (y * mask_c).astype(o_ref.dtype)

    return kernel, halo_rows


# ----------------------------------------------------------------------------
# Wrapper
# ----------------------------------------------------------------------------
def single_stage_forward(x_bct, mask_bt, params, num_classes):
    """x_bct: (B, dim, T) f32, mask_bt: (B, T) f32 (PyTorch layout)."""
    (w_in, b_in, w_dil, b_dil, w_res, b_res, w_out, b_out) = params
    B, dim, T = x_bct.shape
    L = w_dil.shape[0]
    F_pad = w_in.shape[1]
    C_pad = w_out.shape[1]

    x = jnp.transpose(x_bct, (0, 2, 1))        # (B, T, dim)
    mask = mask_bt[:, :, None]                 # (B, T, 1)

    kernel, halo_rows = _make_stage_kernel(L, T, F_pad, C_pad)

    # Weights/biases: block index never changes across the batch grid, so no
    # re-DMA happens; their double-buffer allocation is small at these sizes.
    def full_spec(a):
        return pl.BlockSpec(a.shape, lambda b, _nd=a.ndim: (0,) * _nd)

    out = pl.pallas_call(
        kernel,
        out_shape=jax.ShapeDtypeStruct((B, T, C_pad), jnp.float32),
        grid_spec=pltpu.PrefetchScalarGridSpec(
            num_scalar_prefetch=0,
            grid=(B,),
            in_specs=[
                pl.BlockSpec((1, T, dim), lambda b: (b, 0, 0)),
                pl.BlockSpec((1, T, 1), lambda b: (b, 0, 0)),
                full_spec(w_in), full_spec(b_in),
                full_spec(w_dil), full_spec(b_dil),
                full_spec(w_res), full_spec(b_res),
                full_spec(w_out), full_spec(b_out),
            ],
            out_specs=pl.BlockSpec((1, T, C_pad), lambda b: (b, 0, 0)),
            scratch_shapes=[pltpu.VMEM((halo_rows, F_pad), jnp.float32)],
        ),
        compiler_params=pltpu.CompilerParams(
            dimension_semantics=("parallel",),
            vmem_limit_bytes=32 * 1024 * 1024),
    )(x, mask, w_in, b_in, w_dil, b_dil, w_res, b_res, w_out, b_out)

    out = jnp.transpose(out, (0, 2, 1))        # (B, C_pad, T)
    return out[:, :num_classes, :]             # (B, C, T), matches PyTorch


# ----------------------------------------------------------------------------
# Deterministic parameter init (PyTorch Conv1d layouts -> padded/fused kernel
# layouts: F and C lane-padded to 128, dilated taps fused along K, bf16 weights)
# ----------------------------------------------------------------------------
def init_params(key, num_layers, num_f_maps, dim, num_classes):
    keys = jax.random.split(key, 8)
    s = 0.1
    # PyTorch layouts: Conv1d weight (out, in, k), bias (out,)
    w_in_pt = jax.random.normal(keys[0], (num_f_maps, dim, 1), jnp.float32) * s
    b_in_pt = jax.random.normal(keys[1], (num_f_maps,), jnp.float32) * s
    w_dil_pt = jax.random.normal(
        keys[2], (num_layers, num_f_maps, num_f_maps, 3), jnp.float32) * s
    b_dil_pt = jax.random.normal(keys[3], (num_layers, num_f_maps), jnp.float32) * s
    w_res_pt = jax.random.normal(
        keys[4], (num_layers, num_f_maps, num_f_maps, 1), jnp.float32) * s
    b_res_pt = jax.random.normal(keys[5], (num_layers, num_f_maps), jnp.float32) * s
    w_out_pt = jax.random.normal(
        keys[6], (num_classes, num_f_maps, 1), jnp.float32) * s * 0.5
    b_out_pt = jax.random.normal(keys[7], (num_classes,), jnp.float32) * s

    pt = (w_in_pt, b_in_pt, w_dil_pt, b_dil_pt, w_res_pt, b_res_pt,
          w_out_pt, b_out_pt)

    F_pad = _round_up(num_f_maps, LANE)
    C_pad = _round_up(num_classes, LANE)

    def pad_axis(a, axis, target):
        if a.shape[axis] == target:
            return a
        widths = [(0, 0)] * a.ndim
        widths[axis] = (0, target - a.shape[axis])
        return jnp.pad(a, widths)

    # input 1x1 conv: (dim, F_pad)
    w_in = pad_axis(jnp.transpose(w_in_pt[:, :, 0], (1, 0)), 1, F_pad
                    ).astype(jnp.bfloat16)
    b_in = pad_axis(b_in_pt[None, :], 1, F_pad)                    # (1, F_pad) f32

    # dilated conv, taps fused along K: (L, 3*F_pad, F_pad)
    # tap order [t-d, t, t+d] == kernel index k = 0, 1, 2 (padding = dilation)
    taps = []
    for k in range(3):
        wk = jnp.transpose(w_dil_pt[:, :, :, k], (0, 2, 1))        # (L, F_in, F_out)
        wk = pad_axis(pad_axis(wk, 1, F_pad), 2, F_pad)
        taps.append(wk)
    w_dil = jnp.concatenate(taps, axis=1).astype(jnp.bfloat16)
    b_dil = pad_axis(b_dil_pt[:, None, :], 2, F_pad)               # (L, 1, F_pad) f32

    w_res = pad_axis(pad_axis(jnp.transpose(w_res_pt[:, :, :, 0], (0, 2, 1)),
                              1, F_pad), 2, F_pad).astype(jnp.bfloat16)
    b_res = pad_axis(b_res_pt[:, None, :], 2, F_pad)               # (L, 1, F_pad) f32

    w_out = pad_axis(pad_axis(jnp.transpose(w_out_pt[:, :, 0], (1, 0)),
                              0, F_pad), 1, C_pad).astype(jnp.bfloat16)
    b_out = pad_axis(b_out_pt[None, :], 1, C_pad)                  # (1, C_pad) f32

    kernel_params = (w_in, b_in, w_dil, b_dil, w_res, b_res, w_out, b_out)
    return pt, kernel_params


# ----------------------------------------------------------------------------
# Pure-JAX reference (mirrors the PyTorch forward via lax.conv, eval mode)
# ----------------------------------------------------------------------------
def reference_forward(x, mask, pt_params, num_layers):
    (w_in, b_in, w_dil, b_dil, w_res, b_res, w_out, b_out) = pt_params

    def conv1d(x, w, b, dilation=1, padding=0):
        y = lax.conv_general_dilated(
            x, w, window_strides=(1,), padding=[(padding, padding)],
            rhs_dilation=(dilation,), dimension_numbers=("NCH", "OIH", "NCH"))
        return y + b[None, :, None]

    out = conv1d(x, w_in, b_in)
    m = mask[:, None, :]
    for l in range(num_layers):
        d = 2 ** l
        h = jax.nn.relu(conv1d(out, w_dil[l], b_dil[l], dilation=d, padding=d))
        h = conv1d(h, w_res[l], b_res[l])
        out = (out + h) * m
    out = conv1d(out, w_out, b_out) * m
    return out


# ----------------------------------------------------------------------------
if __name__ == "__main__":
    B, dim, T = 2, 8, 16
    num_layers, num_f_maps, num_classes = 3, 32, 6

    key = jax.random.PRNGKey(0)
    kx, km, kp = jax.random.split(key, 3)

    x = jax.random.normal(kx, (B, dim, T), jnp.float32)
    # binary temporal mask (as in MS-TCN), float32
    mask = (jax.random.uniform(km, (B, T)) > 0.2).astype(jnp.float32)

    pt_params, kernel_params = init_params(
        kp, num_layers, num_f_maps, dim, num_classes)

    run = jax.jit(functools.partial(
        single_stage_forward, params=kernel_params, num_classes=num_classes))
    out = run(x, mask)
    out = jax.block_until_ready(out)

    ref = reference_forward(x, mask, pt_params, num_layers)
    assert out.shape == (B, num_classes, T), out.shape
    # bf16 MXU path with f32 accumulation -> looser tolerance than pure f32.
    assert jnp.allclose(out, ref, rtol=2e-2, atol=2e-2), (
        float(jnp.max(jnp.abs(out - ref))))

    print("KERNEL_OK")
</pallas_src>

<mosaic_0001>
module attributes {stable_mosaic.version = 11 : i64} {
  func.func @kernel(%arg0: i32, %arg1: memref<1x16x8xf32, #tpu.memory_space<vmem>>, %arg2: memref<1x16x1xf32, #tpu.memory_space<vmem>>, %arg3: memref<8x128xbf16, #tpu.memory_space<vmem>>, %arg4: memref<1x128xf32, #tpu.memory_space<vmem>>, %arg5: memref<3x384x128xbf16, #tpu.memory_space<vmem>>, %arg6: memref<3x1x128xf32, #tpu.memory_space<vmem>>, %arg7: memref<3x128x128xbf16, #tpu.memory_space<vmem>>, %arg8: memref<3x1x128xf32, #tpu.memory_space<vmem>>, %arg9: memref<128x128xbf16, #tpu.memory_space<vmem>>, %arg10: memref<1x128xf32, #tpu.memory_space<vmem>>, %arg11: memref<1x16x128xf32, #tpu.memory_space<vmem>>, %arg12: memref<32x128xf32, #tpu.memory_space<vmem>>) attributes {dimension_semantics = [#tpu.dimension_semantics<parallel>], iteration_bounds = array<i64: 2>, scalar_prefetch = 0 : i64, scratch_operands = 1 : i64, tpu.core_type = #tpu.core_type<tc>, window_params = [{transform_indices = @transform_0, window_bounds = array<i64: 1, 16, 8>}, {transform_indices = @transform_1, window_bounds = array<i64: 1, 16, 1>}, {pipeline_mode = #tpu.pipeline_mode<synchronous>, transform_indices = @transform_2, window_bounds = array<i64: 8, 128>}, {pipeline_mode = #tpu.pipeline_mode<synchronous>, transform_indices = @transform_3, window_bounds = array<i64: 1, 128>}, {pipeline_mode = #tpu.pipeline_mode<synchronous>, transform_indices = @transform_4, window_bounds = array<i64: 3, 384, 128>}, {pipeline_mode = #tpu.pipeline_mode<synchronous>, transform_indices = @transform_5, window_bounds = array<i64: 3, 1, 128>}, {pipeline_mode = #tpu.pipeline_mode<synchronous>, transform_indices = @transform_6, window_bounds = array<i64: 3, 128, 128>}, {pipeline_mode = #tpu.pipeline_mode<synchronous>, transform_indices = @transform_7, window_bounds = array<i64: 3, 1, 128>}, {pipeline_mode = #tpu.pipeline_mode<synchronous>, transform_indices = @transform_8, window_bounds = array<i64: 128, 128>}, {pipeline_mode = #tpu.pipeline_mode<synchronous>, transform_indices = @transform_9, window_bounds = array<i64: 1, 128>}, {transform_indices = @transform_10, window_bounds = array<i64: 1, 16, 128>}]} {
    %c0 = arith.constant 0 : index
    %c0_0 = arith.constant 0 : index
    %c0_1 = arith.constant 0 : index
    %0 = vector.load %arg1[%c0, %c0_0, %c0_1] : memref<1x16x8xf32, #tpu.memory_space<vmem>>, vector<1x16x8xf32>
    %1 = vector.shape_cast %0 : vector<1x16x8xf32> to vector<16x8xf32>
    %2 = arith.truncf %1 : vector<16x8xf32> to vector<16x8xbf16>
    %c0_2 = arith.constant 0 : index
    %c0_3 = arith.constant 0 : index
    %c0_4 = arith.constant 0 : index
    %3 = vector.load %arg2[%c0_2, %c0_3, %c0_4] : memref<1x16x1xf32, #tpu.memory_space<vmem>>, vector<1x16x1xf32>
    %4 = vector.shape_cast %3 : vector<1x16x1xf32> to vector<16x1xf32>
    %5 = vector.shape_cast %4 : vector<16x1xf32> to vector<16x1xf32>
    %6 = vector.broadcast %5 : vector<16x1xf32> to vector<16x128xf32>
    %7 = vector.shape_cast %4 : vector<16x1xf32> to vector<16x1xf32>
    %8 = vector.broadcast %7 : vector<16x1xf32> to vector<16x128xf32>
    %c0_5 = arith.constant 0 : index
    %c0_6 = arith.constant 0 : index
    %9 = vector.load %arg3[%c0_5, %c0_6] : memref<8x128xbf16, #tpu.memory_space<vmem>>, vector<8x128xbf16>
    %cst = arith.constant dense<0.000000e+00> : vector<16x128xf32>
    %10 = tpu.matmul %2, %9, %cst {dimension_numbers = #tpu.dot_dimension_numbers<[1], [0], [0], [1], [0, 0, 1, 1], [], []>} : vector<16x8xbf16>, vector<8x128xbf16>, vector<16x128xf32> -> vector<16x128xf32>
    %c0_7 = arith.constant 0 : index
    %c0_8 = arith.constant 0 : index
    %11 = vector.load %arg4[%c0_7, %c0_8] : memref<1x128xf32, #tpu.memory_space<vmem>>, vector<1x128xf32>
    %12 = vector.broadcast %11 : vector<1x128xf32> to vector<16x128xf32>
    %13 = arith.addf %10, %12 : vector<16x128xf32>
    %cst_9 = arith.constant 0.000000e+00 : f32
    %14 = vector.broadcast %cst_9 : f32 to vector<8x128xf32>
    %c0_10 = arith.constant 0 : index
    %c0_11 = arith.constant 0 : index
    %15 = vector.load %arg12[%c0_10, %c0_11] : memref<32x128xf32, #tpu.memory_space<vmem>>, vector<8x128xf32>
    tpu.vector_store %arg12[%c0_10, %c0_11], %14 {strides = array<i32>} : memref<32x128xf32, #tpu.memory_space<vmem>>, vector<8x128xf32>,
    %cst_12 = arith.constant 0.000000e+00 : f32
    %16 = vector.broadcast %cst_12 : f32 to vector<8x128xf32>
    %c24 = arith.constant 24 : index
    %c0_13 = arith.constant 0 : index
    %17 = vector.load %arg12[%c24, %c0_13] : memref<32x128xf32, #tpu.memory_space<vmem>>, vector<8x128xf32>
    tpu.vector_store %arg12[%c24, %c0_13], %16 {strides = array<i32>} : memref<32x128xf32, #tpu.memory_space<vmem>>, vector<8x128xf32>,
    %18 = arith.truncf %13 : vector<16x128xf32> to vector<16x128xbf16>
    %c8 = arith.constant 8 : index
    %c0_14 = arith.constant 0 : index
    %19 = vector.load %arg12[%c8, %c0_14] : memref<32x128xf32, #tpu.memory_space<vmem>>, vector<16x128xf32>
    tpu.vector_store %arg12[%c8, %c0_14], %13 {strides = array<i32>} : memref<32x128xf32, #tpu.memory_space<vmem>>, vector<16x128xf32>,
    %c7 = arith.constant 7 : index
    %c0_15 = arith.constant 0 : index
    %20 = vector.load %arg12[%c7, %c0_15] : memref<32x128xf32, #tpu.memory_space<vmem>>, vector<16x128xf32>
    %21 = arith.truncf %20 : vector<16x128xf32> to vector<16x128xbf16>
    %c9 = arith.constant 9 : index
    %c0_16 = arith.constant 0 : index
    %22 = vector.load %arg12[%c9, %c0_16] : memref<32x128xf32, #tpu.memory_space<vmem>>, vector<16x128xf32>
    %23 = arith.truncf %22 : vector<16x128xf32> to vector<16x128xbf16>
    %24 = tpu.concatenate %21, %18, %23 in 1 : vector<16x128xbf16>, vector<16x128xbf16>, vector<16x128xbf16> -> vector<16x384xbf16>
    %c0_17 = arith.constant 0 : index
    %c0_18 = arith.constant 0 : index
    %c0_19 = arith.constant 0 : index
    %25 = vector.load %arg5[%c0_17, %c0_18, %c0_19] : memref<3x384x128xbf16, #tpu.memory_space<vmem>>, vector<1x384x128xbf16>
    %26 = vector.shape_cast %25 : vector<1x384x128xbf16> to vector<384x128xbf16>
    %cst_20 = arith.constant dense<0.000000e+00> : vector<16x128xf32>
    %27 = tpu.matmul %24, %26, %cst_20 {dimension_numbers = #tpu.dot_dimension_numbers<[1], [0], [0], [1], [0, 0, 1, 1], [], []>} : vector<16x384xbf16>, vector<384x128xbf16>, vector<16x128xf32> -> vector<16x128xf32>
    %c0_21 = arith.constant 0 : index
    %c0_22 = arith.constant 0 : index
    %c0_23 = arith.constant 0 : index
    %28 = vector.load %arg6[%c0_21, %c0_22, %c0_23] : memref<3x1x128xf32, #tpu.memory_space<vmem>>, vector<1x1x128xf32>
    %29 = vector.shape_cast %28 : vector<1x1x128xf32> to vector<1x128xf32>
    %30 = vector.broadcast %29 : vector<1x128xf32> to vector<16x128xf32>
    %31 = arith.addf %27, %30 : vector<16x128xf32>
    %cst_24 = arith.constant 0.000000e+00 : f32
    %32 = vector.broadcast %cst_24 : f32 to vector<16x128xf32>
    %33 = arith.maximumf %31, %32 : vector<16x128xf32>
    %34 = arith.truncf %33 : vector<16x128xf32> to vector<16x128xbf16>
    %c0_25 = arith.constant 0 : index
    %c0_26 = arith.constant 0 : index
    %c0_27 = arith.constant 0 : index
    %35 = vector.load %arg7[%c0_25, %c0_26, %c0_27] : memref<3x128x128xbf16, #tpu.memory_space<vmem>>, vector<1x128x128xbf16>
    %36 = vector.shape_cast %35 : vector<1x128x128xbf16> to vector<128x128xbf16>
    %cst_28 = arith.constant dense<0.000000e+00> : vector<16x128xf32>
    %37 = tpu.matmul %34, %36, %cst_28 {dimension_numbers = #tpu.dot_dimension_numbers<[1], [0], [0], [1], [0, 0, 1, 1], [], []>} : vector<16x128xbf16>, vector<128x128xbf16>, vector<16x128xf32> -> vector<16x128xf32>
    %c0_29 = arith.constant 0 : index
    %c0_30 = arith.constant 0 : index
    %c0_31 = arith.constant 0 : index
    %38 = vector.load %arg8[%c0_29, %c0_30, %c0_31] : memref<3x1x128xf32, #tpu.memory_space<vmem>>, vector<1x1x128xf32>
    %39 = vector.shape_cast %38 : vector<1x1x128xf32> to vector<1x128xf32>
    %40 = vector.broadcast %39 : vector<1x128xf32> to vector<16x128xf32>
    %41 = arith.addf %37, %40 : vector<16x128xf32>
    %42 = arith.addf %13, %41 : vector<16x128xf32>
    %43 = arith.mulf %42, %6 : vector<16x128xf32>
    %44 = arith.truncf %43 : vector<16x128xf32> to vector<16x128xbf16>
    %c8_32 = arith.constant 8 : index
    %c0_33 = arith.constant 0 : index
    %45 = vector.load %arg12[%c8_32, %c0_33] : memref<32x128xf32, #tpu.memory_space<vmem>>, vector<16x128xf32>
    tpu.vector_store %arg12[%c8_32, %c0_33], %43 {strides = array<i32>} : memref<32x128xf32, #tpu.memory_space<vmem>>, vector<16x128xf32>,
    %c6 = arith.constant 6 : index
    %c0_34 = arith.constant 0 : index
    %46 = vector.load %arg12[%c6, %c0_34] : memref<32x128xf32, #tpu.memory_space<vmem>>, vector<16x128xf32>
    %47 = arith.truncf %46 : vector<16x128xf32> to vector<16x128xbf16>
    %c10 = arith.constant 10 : index
    %c0_35 = arith.constant 0 : index
    %48 = vector.load %arg12[%c10, %c0_35] : memref<32x128xf32, #tpu.memory_space<vmem>>, vector<16x128xf32>
    %49 = arith.truncf %48 : vector<16x128xf32> to vector<16x128xbf16>
    %50 = tpu.concatenate %47, %44, %49 in 1 : vector<16x128xbf16>, vector<16x128xbf16>, vector<16x128xbf16> -> vector<16x384xbf16>
    %c1 = arith.constant 1 : index
    %c0_36 = arith.constant 0 : index
    %c0_37 = arith.constant 0 : index
    %51 = vector.load %arg5[%c1, %c0_36, %c0_37] : memref<3x384x128xbf16, #tpu.memory_space<vmem>>, vector<1x384x128xbf16>
    %52 = vector.shape_cast %51 : vector<1x384x128xbf16> to vector<384x128xbf16>
    %cst_38 = arith.constant dense<0.000000e+00> : vector<16x128xf32>
    %53 = tpu.matmul %50, %52, %cst_38 {dimension_numbers = #tpu.dot_dimension_numbers<[1], [0], [0], [1], [0, 0, 1, 1], [], []>} : vector<16x384xbf16>, vector<384x128xbf16>, vector<16x128xf32> -> vector<16x128xf32>
    %c1_39 = arith.constant 1 : index
    %c0_40 = arith.constant 0 : index
    %c0_41 = arith.constant 0 : index
    %54 = vector.load %arg6[%c1_39, %c0_40, %c0_41] : memref<3x1x128xf32, #tpu.memory_space<vmem>>, vector<1x1x128xf32>
    %55 = vector.shape_cast %54 : vector<1x1x128xf32> to vector<1x128xf32>
    %56 = vector.broadcast %55 : vector<1x128xf32> to vector<16x128xf32>
    %57 = arith.addf %53, %56 : vector<16x128xf32>
    %cst_42 = arith.constant 0.000000e+00 : f32
    %58 = vector.broadcast %cst_42 : f32 to vector<16x128xf32>
    %59 = arith.maximumf %57, %58 : vector<16x128xf32>
    %60 = arith.truncf %59 : vector<16x128xf32> to vector<16x128xbf16>
    %c1_43 = arith.constant 1 : index
    %c0_44 = arith.constant 0 : index
    %c0_45 = arith.constant 0 : index
    %61 = vector.load %arg7[%c1_43, %c0_44, %c0_45] : memref<3x128x128xbf16, #tpu.memory_space<vmem>>, vector<1x128x128xbf16>
    %62 = vector.shape_cast %61 : vector<1x128x128xbf16> to vector<128x128xbf16>
    %cst_46 = arith.constant dense<0.000000e+00> : vector<16x128xf32>
    %63 = tpu.matmul %60, %62, %cst_46 {dimension_numbers = #tpu.dot_dimension_numbers<[1], [0], [0], [1], [0, 0, 1, 1], [], []>} : vector<16x128xbf16>, vector<128x128xbf16>, vector<16x128xf32> -> vector<16x128xf32>
    %c1_47 = arith.constant 1 : index
    %c0_48 = arith.constant 0 : index
    %c0_49 = arith.constant 0 : index
    %64 = vector.load %arg8[%c1_47, %c0_48, %c0_49] : memref<3x1x128xf32, #tpu.memory_space<vmem>>, vector<1x1x128xf32>
    %65 = vector.shape_cast %64 : vector<1x1x128xf32> to vector<1x128xf32>
    %66 = vector.broadcast %65 : vector<1x128xf32> to vector<16x128xf32>
    %67 = arith.addf %63, %66 : vector<16x128xf32>
    %68 = arith.addf %43, %67 : vector<16x128xf32>
    %69 = arith.mulf %68, %6 : vector<16x128xf32>
    %70 = arith.truncf %69 : vector<16x128xf32> to vector<16x128xbf16>
    %c8_50 = arith.constant 8 : index
    %c0_51 = arith.constant 0 : index
    %71 = vector.load %arg12[%c8_50, %c0_51] : memref<32x128xf32, #tpu.memory_space<vmem>>, vector<16x128xf32>
    tpu.vector_store %arg12[%c8_50, %c0_51], %69 {strides = array<i32>} : memref<32x128xf32, #tpu.memory_space<vmem>>, vector<16x128xf32>,
    %c4 = arith.constant 4 : index
    %c0_52 = arith.constant 0 : index
    %72 = vector.load %arg12[%c4, %c0_52] : memref<32x128xf32, #tpu.memory_space<vmem>>, vector<16x128xf32>
    %73 = arith.truncf %72 : vector<16x128xf32> to vector<16x128xbf16>
    %c12 = arith.constant 12 : index
    %c0_53 = arith.constant 0 : index
    %74 = vector.load %arg12[%c12, %c0_53] : memref<32x128xf32, #tpu.memory_space<vmem>>, vector<16x128xf32>
    %75 = arith.truncf %74 : vector<16x128xf32> to vector<16x128xbf16>
    %76 = tpu.concatenate %73, %70, %75 in 1 : vector<16x128xbf16>, vector<16x128xbf16>, vector<16x128xbf16> -> vector<16x384xbf16>
    %c2 = arith.constant 2 : index
    %c0_54 = arith.constant 0 : index
    %c0_55 = arith.constant 0 : index
    %77 = vector.load %arg5[%c2, %c0_54, %c0_55] : memref<3x384x128xbf16, #tpu.memory_space<vmem>>, vector<1x384x128xbf16>
    %78 = vector.shape_cast %77 : vector<1x384x128xbf16> to vector<384x128xbf16>
    %cst_56 = arith.constant dense<0.000000e+00> : vector<16x128xf32>
    %79 = tpu.matmul %76, %78, %cst_56 {dimension_numbers = #tpu.dot_dimension_numbers<[1], [0], [0], [1], [0, 0, 1, 1], [], []>} : vector<16x384xbf16>, vector<384x128xbf16>, vector<16x128xf32> -> vector<16x128xf32>
    %c2_57 = arith.constant 2 : index
    %c0_58 = arith.constant 0 : index
    %c0_59 = arith.constant 0 : index
    %80 = vector.load %arg6[%c2_57, %c0_58, %c0_59] : memref<3x1x128xf32, #tpu.memory_space<vmem>>, vector<1x1x128xf32>
    %81 = vector.shape_cast %80 : vector<1x1x128xf32> to vector<1x128xf32>
    %82 = vector.broadcast %81 : vector<1x128xf32> to vector<16x128xf32>
    %83 = arith.addf %79, %82 : vector<16x128xf32>
    %cst_60 = arith.constant 0.000000e+00 : f32
    %84 = vector.broadcast %cst_60 : f32 to vector<16x128xf32>
    %85 = arith.maximumf %83, %84 : vector<16x128xf32>
    %86 = arith.truncf %85 : vector<16x128xf32> to vector<16x128xbf16>
    %c2_61 = arith.constant 2 : index
    %c0_62 = arith.constant 0 : index
    %c0_63 = arith.constant 0 : index
    %87 = vector.load %arg7[%c2_61, %c0_62, %c0_63] : memref<3x128x128xbf16, #tpu.memory_space<vmem>>, vector<1x128x128xbf16>
    %88 = vector.shape_cast %87 : vector<1x128x128xbf16> to vector<128x128xbf16>
    %cst_64 = arith.constant dense<0.000000e+00> : vector<16x128xf32>
    %89 = tpu.matmul %86, %88, %cst_64 {dimension_numbers = #tpu.dot_dimension_numbers<[1], [0], [0], [1], [0, 0, 1, 1], [], []>} : vector<16x128xbf16>, vector<128x128xbf16>, vector<16x128xf32> -> vector<16x128xf32>
    %c2_65 = arith.constant 2 : index
    %c0_66 = arith.constant 0 : index
    %c0_67 = arith.constant 0 : index
    %90 = vector.load %arg8[%c2_65, %c0_66, %c0_67] : memref<3x1x128xf32, #tpu.memory_space<vmem>>, vector<1x1x128xf32>
    %91 = vector.shape_cast %90 : vector<1x1x128xf32> to vector<1x128xf32>
    %92 = vector.broadcast %91 : vector<1x128xf32> to vector<16x128xf32>
    %93 = arith.addf %89, %92 : vector<16x128xf32>
    %94 = arith.addf %69, %93 : vector<16x128xf32>
    %95 = arith.mulf %94, %6 : vector<16x128xf32>
    %96 = arith.truncf %95 : vector<16x128xf32> to vector<16x128xbf16>
    %c0_68 = arith.constant 0 : index
    %c0_69 = arith.constant 0 : index
    %97 = vector.load %arg9[%c0_68, %c0_69] : memref<128x128xbf16, #tpu.memory_space<vmem>>, vector<128x128xbf16>
    %cst_70 = arith.constant dense<0.000000e+00> : vector<16x128xf32>
    %98 = tpu.matmul %96, %97, %cst_70 {dimension_numbers = #tpu.dot_dimension_numbers<[1], [0], [0], [1], [0, 0, 1, 1], [], []>} : vector<16x128xbf16>, vector<128x128xbf16>, vector<16x128xf32> -> vector<16x128xf32>
    %c0_71 = arith.constant 0 : index
    %c0_72 = arith.constant 0 : index
    %99 = vector.load %arg10[%c0_71, %c0_72] : memref<1x128xf32, #tpu.memory_space<vmem>>, vector<1x128xf32>
    %100 = vector.broadcast %99 : vector<1x128xf32> to vector<16x128xf32>
    %101 = arith.addf %98, %100 : vector<16x128xf32>
    %102 = arith.mulf %101, %8 : vector<16x128xf32>
    %c0_73 = arith.constant 0 : index
    %c0_74 = arith.constant 0 : index
    %c0_75 = arith.constant 0 : index
    %103 = vector.load %arg11[%c0_73, %c0_74, %c0_75] : memref<1x16x128xf32, #tpu.memory_space<vmem>>, vector<1x16x128xf32>
    %104 = vector.shape_cast %103 : vector<1x16x128xf32> to vector<16x128xf32>
    %105 = vector.shape_cast %102 : vector<16x128xf32> to vector<1x16x128xf32>
    tpu.vector_store %arg11[%c0_73, %c0_74, %c0_75], %105 {strides = array<i32>} : memref<1x16x128xf32, #tpu.memory_space<vmem>>, vector<1x16x128xf32>,
    return
  }
  func.func @transform_0(%arg0: i32) -> (i32, i32, i32) {
    %c0_i32 = arith.constant 0 : i32
    %c0_i32_0 = arith.constant 0 : i32
    %c0_i32_1 = arith.constant 0 : i32
    return %arg0, %c0_i32, %c0_i32_0 : i32, i32, i32
  }
  func.func @transform_1(%arg0: i32) -> (i32, i32, i32) {
    %c0_i32 = arith.constant 0 : i32
    %c0_i32_0 = arith.constant 0 : i32
    %c0_i32_1 = arith.constant 0 : i32
    return %arg0, %c0_i32, %c0_i32_0 : i32, i32, i32
  }
  func.func @transform_2(%arg0: i32) -> (i32, i32) {
    %c0_i32 = arith.constant 0 : i32
    %c0_i32_0 = arith.constant 0 : i32
    %c0_i32_1 = arith.constant 0 : i32
    return %c0_i32, %c0_i32_0 : i32, i32
  }
  func.func @transform_3(%arg0: i32) -> (i32, i32) {
    %c0_i32 = arith.constant 0 : i32
    %c0_i32_0 = arith.constant 0 : i32
    %c0_i32_1 = arith.constant 0 : i32
    return %c0_i32, %c0_i32_0 : i32, i32
  }
  func.func @transform_4(%arg0: i32) -> (i32, i32, i32) {
    %c0_i32 = arith.constant 0 : i32
    %c0_i32_0 = arith.constant 0 : i32
    %c0_i32_1 = arith.constant 0 : i32
    %c0_i32_2 = arith.constant 0 : i32
    return %c0_i32, %c0_i32_0, %c0_i32_1 : i32, i32, i32
  }
  func.func @transform_5(%arg0: i32) -> (i32, i32, i32) {
    %c0_i32 = arith.constant 0 : i32
    %c0_i32_0 = arith.constant 0 : i32
    %c0_i32_1 = arith.constant 0 : i32
    %c0_i32_2 = arith.constant 0 : i32
    return %c0_i32, %c0_i32_0, %c0_i32_1 : i32, i32, i32
  }
  func.func @transform_6(%arg0: i32) -> (i32, i32, i32) {
    %c0_i32 = arith.constant 0 : i32
    %c0_i32_0 = arith.constant 0 : i32
    %c0_i32_1 = arith.constant 0 : i32
    %c0_i32_2 = arith.constant 0 : i32
    return %c0_i32, %c0_i32_0, %c0_i32_1 : i32, i32, i32
  }
  func.func @transform_7(%arg0: i32) -> (i32, i32, i32) {
    %c0_i32 = arith.constant 0 : i32
    %c0_i32_0 = arith.constant 0 : i32
    %c0_i32_1 = arith.constant 0 : i32
    %c0_i32_2 = arith.constant 0 : i32
    return %c0_i32, %c0_i32_0, %c0_i32_1 : i32, i32, i32
  }
  func.func @transform_8(%arg0: i32) -> (i32, i32) {
    %c0_i32 = arith.constant 0 : i32
    %c0_i32_0 = arith.constant 0 : i32
    %c0_i32_1 = arith.constant 0 : i32
    return %c0_i32, %c0_i32_0 : i32, i32
  }
  func.func @transform_9(%arg0: i32) -> (i32, i32) {
    %c0_i32 = arith.constant 0 : i32
    %c0_i32_0 = arith.constant 0 : i32
    %c0_i32_1 = arith.constant 0 : i32
    return %c0_i32, %c0_i32_0 : i32, i32
  }
  func.func @transform_10(%arg0: i32) -> (i32, i32, i32) {
    %c0_i32 = arith.constant 0 : i32
    %c0_i32_0 = arith.constant 0 : i32
    %c0_i32_1 = arith.constant 0 : i32
    return %arg0, %c0_i32, %c0_i32_0 : i32, i32, i32
  }
}

</mosaic_0001>

<bundles_post_ra>
// kernel: single_stage_forward.1
= control target key start
LH: loop header
LB: loop body
LE: loop exit
PB: predicated region body
PF: predicated region fallthrough
CT: control target
= control target key end

     0   :  { %15 = vsyncpa [#allocation4], 0  ;;  %s2577_s0 = inlined_call_operand.vmem [shape: f32[2,16,8], index: 0, kind: input, shape index: {}]   ;;  %s2578_s1 = inlined_call_operand.vmem [shape: f32[2,16,1], index: 1, kind: input, shape index: {}]   ;;  %s2579_s2 = inlined_call_operand.vmem [shape: bf16[8,128], index: 2, kind: input, shape index: {}]   ;;  %s2580_s3 = inlined_call_operand.vmem [shape: f32[1,128], index: 3, kind: input, shape index: {}]   ;;  %s2581_s4 = inlined_call_operand.hbm [shape: bf16[3,384,128], index: 4, kind: input, shape index: {}]   ;;  %s2582_s5 = inlined_call_operand.vmem [shape: f32[3,1,128], index: 5, kind: input, shape index: {}]   ;;  %s2583_s6 = inlined_call_operand.hbm [shape: bf16[3,128,128], index: 6, kind: input, shape index: {}]   ;;  %s2584_s7 = inlined_call_operand.vmem [shape: f32[3,1,128], index: 7, kind: input, shape index: {}]   ;;  %s2585_s8 = inlined_call_operand.vmem [shape: bf16[128,128], index: 8, kind: input, shape index: {}]   ;;  %s2586_s9 = inlined_call_operand.vmem [shape: f32[1,128], index: 9, kind: input, shape index: {}]   ;;  %s2587_s10 = inlined_call_operand.vmem [shape: f32[2,16,128], index: 10, kind: output, shape index: {}]  }
   0x1   :  { %16 = vsyncpa [#allocation6], 0  ;;  %s2434_s13 = smov 0  }
   0x2 LB: > { %s290_s16 = sshll.u32 %s2581_s4, 4  ;;  %s1710_s17 = sadd.s32 4294967295, %s2371_s13   ;;  %s2371_s13 = sphi %s2434_s13, %s22_s13   ;;  %s291_s16 = int_to_ptr.hbm [resolvable:$true] %s290_s16 }
   0x3   : > { %p1712_p0 = scmp.ge.s32.totalorder %s2371_s13, 1  ;;  %p273_p1 = scmp.lt.s32.totalorder %s2371_s13, 3 }
   0x4   : > { %p2270_p2 = scmp.eq.s32.totalorder %s1710_s17, 0  ;;  %s2373_s19 = smov [#allocation3]  }
   0x5   : > { %p2445_p3 = pnand %p1712_p0, %p273_p1  ;;  %s292_s20 = sshll.u32 %s2373_s19, 4  ;;  %s293_s20 = int_to_ptr.vmem [resolvable:$true] %s292_s20 }
   0x6   : > { %s307_s23 = sshll.u32 %s2583_s6, 4  ;;  %s2374_s24 = smov [#allocation5]   ;;  %s308_s23 = int_to_ptr.hbm [resolvable:$true] %s307_s23 }
   0x7   : > { %p2263_p4 = pneg %p2445_p3  ;;  %s309_s25 = sshll.u32 %s2374_s24, 4  ;;  %s310_s25 = int_to_ptr.vmem [resolvable:$true] %s309_s25 }
   0x8   : > { %s2375_s26 = smov 64   ;;  %s2376_s27 = smov 4  }
   0x9   : > { %p2264_p5 = pnand %p2270_p2, %p2263_p4  ;;  %350 = sbr.rel (%p2445_p3) target bundleno = 1204 (0x4b4), region = 60 }
   0xb   : > { %2266 = dma.hbm_to_vmem [thread:$0]  (!%p2264_p5), %s291_s16, 9216, %s293_s20, [#allocation4], %s2375_s26, %s2375_s26, %s2376_s27  }
   0xc   : > { %2269 = dma.hbm_to_vmem [thread:$0]  (!%p2264_p5), %s308_s23, 3072, %s310_s25, [#allocation6], %s2375_s26, %s2375_s26, %s2376_s27  }
   0xe   : > { %2362 = dma.done.wait (%p2270_p2), [#allocation4], 9216  }
   0xf   : > { %2364 = vsyncadd (%p2270_p2), [#allocation4], 4294958080 }
  0x10   : > { %2366 = dma.done.wait (%p2270_p2), [#allocation6], 3072  }
  0x11   : > { %2368 = vsyncadd (%p2270_p2), [#allocation6], 4294964224  ;;  %p399_p6 = scmp.lt.s32.totalorder %s1710_s17, 1  ;;  %vm439_vm0 = vcmask 1043456   ;;  %v430_v0 = vld [vmem:[%s2579_s2] sm:$0xf] }
  0x12   : > { %v441_v3 = vsel %vm439_vm0, %v430_v0, 0  ;;  %v2166_v5 = vld [vmem:[#allocation3 + $0x78] sm:$0xff]  ;;  %vm435_vm1 = vcmask 64512   ;;  %v2165_v8 = vld [vmem:[#allocation3 + $0x70] sm:$0xff]  ;;  %v2164_v11 = vld [vmem:[#allocation3 + $0x68] sm:$0xff]  ;;  %v2377_v19 = vmov 0.0  }
  0x13   : > { %s2590_s17 = smov (!%p399_p6, %s1710_s17), 1  ;;  %v2158_v6 = vld [vmem:[#allocation3 + $0x38] sm:$0xff]  ;;  %450 = vmatpush.bf16.msra.mxu0 %v441_v3  ;;  %699 = vmatpush.bf16.msra.mxu2 %v2166_v5  ;;  %v2157_v9 = vld [vmem:[#allocation3 + $0x30] sm:$0xff]  ;;  %v2163_v12 = vld [vmem:[#allocation3 + $0x60] sm:$0xff]  ;;  %457 = vst [vmem:[#allocation2] sm:$0xff] %v2377_v19  ;;  %v2378_v0 = vmov 0  }
  0x14   : > { %s2461_s28 = sshll.u32 %s2590_s17, 4  ;;  %v2174_v7 = vld [vmem:[#allocation3 + $0xb8] sm:$0xff]  ;;  %685 = vmatpush.bf16.msra.mxu1 %v2158_v6  ;;  %v2173_v10 = vld [vmem:[#allocation3 + $0xb0] sm:$0xff]  ;;  %v2156_v13 = vld [vmem:[#allocation3 + $0x28] sm:$0xff]  ;;  %458 = vst [vmem:[#allocation2 + $0x18] sm:$0xff] %v2377_v19  ;;  %2288 = vset.pattern.permute.xlu0 %v2378_v0 }
  0x15   : > { %s403_s11 = scalar_lea.vmem %s2577_s0, %s2461_s28  ;;  %713 = vmatpush.bf16.msra.mxu3 %v2174_v7  ;;  %v2162_v14 = vld [vmem:[#allocation3 + $0x58] sm:$0xff]  ;;  %v2172_v15 = vld [vmem:[#allocation3 + $0xa8] sm:$0xff]  ;;  %v2155_v16 = vld [vmem:[#allocation3 + $0x20] sm:$0xff]  ;;  %s408_s19 = scalar_lea.vmem %s2578_s1, %s2461_s28 }
  0x16   : > { %v415_v1 = vld [vmem:[%s403_s11] sm:$0xff]  ;;  %v416_v2 = vld [vmem:[%s403_s11 + $0x8] sm:$0xff]  ;;  %v2161_v17 = vld [vmem:[#allocation3 + $0x50] sm:$0xff]  ;;  %s413_s16 = scalar_lea.vmem %s2587_s10, %s2461_s28 }
  0x17   : > { %v417_v4 = vpack.c.bf16 %v416_v2, %v415_v1  ;;  %700 = vmatpush.bf16.msra.mxu2 %v2165_v8  ;;  %v2171_v18 = vld [vmem:[#allocation3 + $0xa0] sm:$0xff]  ;;  %v2154_v20 = vld [vmem:[#allocation3 + $0x18] sm:$0xff]  ;;  %v2160_v21 = vld [vmem:[#allocation3 + $0x48] sm:$0xff] }
  0x18   : > { %686 = vmatpush.bf16.msra.mxu1 %v2157_v9  ;;  %v2170_v22 = vld [vmem:[#allocation3 + $0x98] sm:$0xff]  ;;  %v2153_v23 = vld [vmem:[#allocation3 + $0x10] sm:$0xff]  ;;  %v2159_v24 = vld [vmem:[#allocation3 + $0x40] sm:$0xff] }
  0x19   : > { %1725 = vmatmul.msk.bf16.vlgmr.msra.gmra.mxu0 %vm435_vm1, %v417_v4  ;;  %714 = vmatpush.bf16.msra.mxu3 %v2173_v10  ;;  %v2169_v25 = vld [vmem:[#allocation3 + $0x90] sm:$0xff]  ;;  %v2152_v26 = vld [vmem:[#allocation3 + $0x8] sm:$0xff]  ;;  %v2151_v28 = vld [vmem:[#allocation3] sm:$0xff] }
  0x1a   : > { %v2168_v27 = vld [vmem:[#allocation3 + $0x88] sm:$0xff]  ;;  %v2167_v29 = vld [vmem:[#allocation3 + $0x80] sm:$0xff]  ;;  %v2182_v30 = vld [vmem:[#allocation5 + $0x38] sm:$0xff] }
  0x1b   : > { %701 = vmatpush.bf16.msra.mxu2 %v2164_v11  ;;  %798 = vmatpush.bf16.msrb.mxu0 %v2182_v30  ;;  %v2181_v31 = vld [vmem:[#allocation5 + $0x30] sm:$0xff]  ;;  %v2289_v32 = vld [vmem:[%s2580_s3] ss:$0 sm:$0xff]  ;;  %v2180_v56 = vld [vmem:[#allocation5 + $0x28] sm:$0xff] }
  0x1c   : > { %687 = vmatpush.bf16.msra.mxu1 %v2156_v13  ;;  %v2179_v57 = vld [vmem:[#allocation5 + $0x20] sm:$0xff]  ;;  %v2178_v58 = vld [vmem:[#allocation5 + $0x18] sm:$0xff]  ;;  %v2177_v59 = vld [vmem:[#allocation5 + $0x10] sm:$0xff] }
  0x1d   : > { %715 = vmatpush.bf16.msra.mxu3 %v2172_v15  ;;  %v2176_v60 = vld [vmem:[#allocation5 + $0x8] sm:$0xff]  ;;  %v2175_v61 = vld [vmem:[#allocation5] sm:$0xff]  ;;  %v2198_v63 = vld [vmem:[#allocation3 + $0x138] sm:$0xff] }
  0x1e   : > { %v418_v62 = vld [vmem:[%s408_s19] sm:$0xff]  ;;  %v2197_v1 = vld [vmem:[#allocation3 + $0x130] sm:$0xff]  ;;  %v419_v2 = vld [vmem:[%s408_s19 + $0x8] sm:$0xff] }
  0x1f   : > { %702 = vmatpush.bf16.msra.mxu2 %v2163_v12  ;;  %799 = vmatpush.bf16.msrb.mxu0 %v2181_v31  ;;  %v2290_v5 = vld [vmem:[%s2582_s5] ss:$0 sm:$0xff]  ;;  %v2190_v19 = vld [vmem:[#allocation3 + $0xf8] sm:$0xff] }
  0x20   : > { %688 = vmatpush.bf16.msra.mxu1 %v2155_v16  ;;  %422 = vperm.xlu0 %2288, %v418_v62   ;;  %v2203_v30 = vld [vmem:[#allocation3 + $0x160] sm:$0xff]  ;;  %v2186_v31 = vld [vmem:[#allocation3 + $0xd8] sm:$0xff] }
  0x21   : > { %716 = vmatpush.bf16.msra.mxu3 %v2171_v18 }
  0x23   : > { %703 = vmatpush.bf16.msra.mxu2 %v2162_v14  ;;  %800 = vmatpush.bf16.msrb.mxu0 %v2180_v56 }
  0x24   : > { %689 = vmatpush.bf16.msra.mxu1 %v2154_v20  ;;  %v2196_v20 = vld [vmem:[#allocation3 + $0x128] sm:$0xff] }
  0x25   : > { %717 = vmatpush.bf16.msra.mxu3 %v2170_v22  ;;  %v2189_v22 = vld [vmem:[#allocation3 + $0xf0] sm:$0xff] }
  0x27   : > { %704 = vmatpush.bf16.msra.mxu2 %v2161_v17  ;;  %801 = vmatpush.bf16.msrb.mxu0 %v2179_v57 }
  0x28   : > { %690 = vmatpush.bf16.msra.mxu1 %v2153_v23  ;;  %427 = vperm.xlu0 %2288, %v419_v2   ;;  %v2195_v23 = vld [vmem:[#allocation3 + $0x120] sm:$0xff] }
  0x29   : > { %718 = vmatpush.bf16.msra.mxu3 %v2169_v25  ;;  %v2188_v25 = vld [vmem:[#allocation3 + $0xe8] sm:$0xff] }
  0x2b   : > { %705 = vmatpush.bf16.msra.mxu2 %v2160_v21  ;;  %802 = vmatpush.bf16.msrb.mxu0 %v2178_v58  ;;  %v2206_v21 = vld [vmem:[#allocation3 + $0x178] sm:$0xff] }
  0x2c   : > { %691 = vmatpush.bf16.msra.mxu1 %v2152_v26  ;;  %v2194_v26 = vld [vmem:[#allocation3 + $0x118] sm:$0xff] }
  0x2d   : > { %719 = vmatpush.bf16.msra.mxu3 %v2168_v27  ;;  %v2204_v27 = vld [vmem:[#allocation3 + $0x168] sm:$0xff] }
  0x2f   : > { %706 = vmatpush.bf16.msra.mxu2 %v2159_v24  ;;  %803 = vmatpush.bf16.msrb.mxu0 %v2177_v59  ;;  %v2205_v24 = vld [vmem:[#allocation3 + $0x170] sm:$0xff] }
  0x30   : > { %692 = vmatpush.bf16.msra.mxu1 %v2151_v28  ;;  %v2187_v28 = vld [vmem:[#allocation3 + $0xe0] sm:$0xff] }
  0x31   : > { %720 = vmatpush.bf16.msra.mxu3 %v2167_v29  ;;  %v2193_v29 = vld [vmem:[#allocation3 + $0x110] sm:$0xff] }
  0x33   : > { %804 = vmatpush.bf16.msrb.mxu0 %v2176_v60  ;;  %1058 = vmatpush.bf16.msrb.mxu2 %v2198_v63 }
  0x34   : > { %1044 = vmatpush.bf16.msrb.mxu1 %v2190_v19  ;;  %v2228_v19 = vld [vmem:[#allocation3 + $0x1e8] sm:$0xff] }
  0x35   : > { %1072 = vmatpush.bf16.msrb.mxu3 %v2206_v21 }
  0x37   : > { %805 = vmatpush.bf16.msrb.mxu0 %v2175_v61  ;;  %1059 = vmatpush.bf16.msrb.mxu2 %v2197_v1 }
  0x38   : > { %1045 = vmatpush.bf16.msrb.mxu1 %v2189_v22  ;;  %v2292_v22 = vld [vmem:[%s2582_s5 + $0x1] ss:$0 sm:$0xff] }
  0x39   : > { %1073 = vmatpush.bf16.msrb.mxu3 %v2205_v24 }
  0x3b   : > { %1060 = vmatpush.bf16.msrb.mxu2 %v2196_v20 }
  0x3c   : > { %1046 = vmatpush.bf16.msrb.mxu1 %v2188_v25 }
  0x3d   : > { %1074 = vmatpush.bf16.msrb.mxu3 %v2204_v27 }
  0x3f   : > { %1061 = vmatpush.bf16.msrb.mxu2 %v2195_v23 }
  0x40   : > { %1047 = vmatpush.bf16.msrb.mxu1 %v2187_v28 }
  0x41   : > { %1075 = vmatpush.bf16.msrb.mxu3 %v2203_v30 }
  0x43   : > { %1062 = vmatpush.bf16.msrb.mxu2 %v2194_v26 }
  0x44   : > { %1048 = vmatpush.bf16.msrb.mxu1 %v2186_v31 }
  0x47   : > { %1063 = vmatpush.bf16.msrb.mxu2 %v2193_v29 }
  0x96   : > { %v452_v33 = vpop.f32.mrf.mxu0 }
  0x97   : > { %v2473_v34 = vadd.f32 %v2289_v32, %v452_v33  ;;  %v2202_v33 = vld [vmem:[#allocation3 + $0x158] sm:$0xff] }
  0x98   : > { %1076 = vmatpush.bf16.msrb.mxu3 %v2202_v33 }
  0x99   : > { %461 = vst [vmem:[#allocation2 + $0x8] sm:$0xff] %v2473_v34  ;;  %v459_v37 = vpack.c.bf16 %v2473_v34, %v2473_v34 }
  0x9b   : > { %v479_v39 = vunpack.c.l.b16 %v459_v37  ;;  %v2191_v37 = vld [vmem:[#allocation3 + $0x100] sm:$0xff] }
  0x9e   : > { %v454_v35 = vpop.f32.mrf.mxu0 }
  0x9f   : > { %v2476_v36 = vadd.f32 %v2289_v32, %v454_v35  ;;  %v2192_v32 = vld [vmem:[#allocation3 + $0x108] sm:$0xff]  ;;  %v2185_v35 = vld [vmem:[#allocation3 + $0xd0] sm:$0xff] }
  0xa0   : > { %v463_v41 = vld [vmem:[#allocation2 + $0x7] sm:$0xff]  ;;  %1064 = vmatpush.bf16.msrb.mxu2 %v2192_v32  ;;  %1049 = vmatpush.bf16.msrb.mxu1 %v2185_v35 }
  0xa1   : > { %462 = vst [vmem:[#allocation2 + $0x10] sm:$0xff] %v2476_v36  ;;  %v460_v38 = vpack.c.bf16 %v2476_v36, %v2476_v36  ;;  %v465_v43 = vpack.c.bf16 %v463_v41, %v463_v41  ;;  %v2183_v41 = vld [vmem:[#allocation3 + $0xc0] sm:$0xff] }
  0xa3   : > { %v480_v40 = vunpack.c.l.b16 %v460_v38  ;;  %v473_v50 = vunpack.c.l.b16 %v465_v43  ;;  %v2201_v38 = vld [vmem:[#allocation3 + $0x150] sm:$0xff]  ;;  %v2291_v43 = vld [vmem:[%s2584_s7] ss:$0 sm:$0xff] }
  0xa4   : > { %1065 = vmatpush.bf16.msrb.mxu2 %v2191_v37  ;;  %1077 = vmatpush.bf16.msrb.mxu3 %v2201_v38  ;;  %v2221_v38 = vld [vmem:[#allocation3 + $0x1b0] sm:$0xff] }
  0xa5   : > { %v481_v42 = vpack.c.b16 %v480_v40, %v479_v39  ;;  %v2184_v39 = vld [vmem:[#allocation3 + $0xc8] sm:$0xff] }
  0xa6   : > { %v2200_v40 = vld [vmem:[#allocation3 + $0x148] sm:$0xff]  ;;  %1050 = vmatpush.bf16.msrb.mxu1 %v2184_v39  ;;  %v2227_v39 = vld [vmem:[#allocation3 + $0x1e0] sm:$0xff] }
  0xa7   : > { %707 = vmatmul.bf16.vlgmr.msra.gmra.mxu2 %v481_v42  ;;  %v2199_v42 = vld [vmem:[#allocation3 + $0x140] sm:$0xff] }
  0xa8   : > { %v464_v44 = vld [vmem:[#allocation2 + $0xf] sm:$0xff]  ;;  %1078 = vmatpush.bf16.msrb.mxu3 %v2200_v40 }
  0xa9   : > { %v467_v45 = vld [vmem:[#allocation2 + $0x9] sm:$0xff]  ;;  %v468_v46 = vld [vmem:[#allocation2 + $0x11] sm:$0xff]  ;;  %v466_v47 = vpack.c.bf16 %v464_v44, %v464_v44 }
  0xaa   : > { %v469_v48 = vpack.c.bf16 %v467_v45, %v467_v45  ;;  %v470_v49 = vpack.c.bf16 %v468_v46, %v468_v46  ;;  %1051 = vmatpush.bf16.msrb.mxu1 %v2183_v41  ;;  %v2214_v44 = vld [vmem:[#allocation5 + $0x78] sm:$0xff]  ;;  %v2213_v45 = vld [vmem:[#allocation5 + $0x70] sm:$0xff]  ;;  %v2220_v41 = vld [vmem:[#allocation3 + $0x1a8] sm:$0xff] }
  0xab   : > { %v474_v51 = vunpack.c.l.b16 %v466_v47  ;;  %1159 = vmatpush.bf16.msra.mxu0 %v2214_v44  ;;  %v2237_v40 = vld [vmem:[#allocation3 + $0x230] sm:$0xff]  ;;  %v2219_v44 = vld [vmem:[#allocation3 + $0x1a0] sm:$0xff] }
  0xac   : > { %v485_v52 = vunpack.c.l.b16 %v469_v48  ;;  %v486_v53 = vunpack.c.l.b16 %v470_v49  ;;  %1079 = vmatpush.bf16.msrb.mxu3 %v2199_v42  ;;  %v2493_v48 = vpop.permute.xlu0 %422  ;;  %v2226_v42 = vld [vmem:[#allocation3 + $0x1d8] sm:$0xff] }
  0xad   : > { %v475_v54 = vpack.c.b16 %v474_v51, %v473_v50 }
  0xae   : > { %v487_v55 = vpack.c.b16 %v486_v53, %v485_v52 }
  0xaf   : > { %693 = vmatmul.bf16.vlgmr.msra.gmra.mxu1 %v475_v54  ;;  %1160 = vmatpush.bf16.msra.mxu0 %v2213_v45  ;;  %v2225_v45 = vld [vmem:[#allocation3 + $0x1d0] sm:$0xff] }
  0xb0   : > { %721 = vmatmul.bf16.vlgmr.msra.gmra.mxu3 %v487_v55 }
  0xb4   : > { %v2501_v54 = vpop.permute.xlu0 %427 }
 0x12a   : > { %v708_v4 = vpop.f32.mrf.mxu2 }
 0x12c   : > { %v694_v3 = vpop.f32.mrf.mxu1 }
 0x12d   : > { %v695_v7 = vadd.f32 %v2290_v5, %v694_v3 }
 0x12f   : > { %v709_v10 = vadd.f32 %v708_v4, %v695_v7 }
 0x132   : > { %v710_v11 = vpop.f32.mrf.mxu2 }
 0x133   : > { %v722_v6 = vpop.f32.mrf.mxu3 }
 0x134   : > { %v696_v8 = vpop.f32.mrf.mxu1  ;;  %v723_v12 = vadd.f32 %v722_v6, %v709_v10  ;;  %v2211_v10 = vld [vmem:[#allocation5 + $0x60] sm:$0xff] }
 0x135   : > { %v697_v9 = vadd.f32 %v2290_v5, %v696_v8 }
 0x136   : > { %v727_v16 = vmax.f32 %v723_v12, 0.0  ;;  %v2209_v12 = vld [vmem:[#allocation5 + $0x50] sm:$0xff] }
 0x137   : > { %v711_v13 = vadd.f32 %v710_v11, %v697_v9  ;;  %v2212_v9 = vld [vmem:[#allocation5 + $0x68] sm:$0xff]  ;;  %v2210_v11 = vld [vmem:[#allocation5 + $0x58] sm:$0xff] }
 0x138   : > { %1161 = vmatpush.bf16.msra.mxu0 %v2212_v9 }
 0x13b   : > { %v724_v14 = vpop.f32.mrf.mxu3 }
 0x13c   : > { %v725_v15 = vadd.f32 %v724_v14, %v711_v13  ;;  %1162 = vmatpush.bf16.msra.mxu0 %v2211_v10  ;;  %v2208_v13 = vld [vmem:[#allocation5 + $0x48] sm:$0xff]  ;;  %v2207_v14 = vld [vmem:[#allocation5 + $0x40] sm:$0xff] }
 0x13e   : > { %v728_v17 = vmax.f32 %v725_v15, 0.0  ;;  %v2230_v15 = vld [vmem:[#allocation3 + $0x1f8] sm:$0xff] }
 0x13f   : > { %1415 = vmatpush.bf16.msra.mxu2 %v2230_v15 }
 0x140   : > { %v729_v18 = vpack.c.bf16 %v728_v17, %v727_v16  ;;  %1163 = vmatpush.bf16.msra.mxu0 %v2210_v11  ;;  %v2222_v16 = vld [vmem:[#allocation3 + $0x1b8] sm:$0xff] }
 0x141   : > { %v2238_v17 = vld [vmem:[#allocation3 + $0x238] sm:$0xff]  ;;  %1401 = vmatpush.bf16.msra.mxu1 %v2222_v16 }
 0x142   : > { %806 = vmatmul.bf16.vlgmr.msrb.gmra.mxu0 %v729_v18  ;;  %v2229_v18 = vld [vmem:[#allocation3 + $0x1f0] sm:$0xff]  ;;  %1429 = vmatpush.bf16.msra.mxu3 %v2238_v17 }
 0x143   : > { %1416 = vmatpush.bf16.msra.mxu2 %v2229_v18 }
 0x144   : > { %1164 = vmatpush.bf16.msra.mxu0 %v2209_v12 }
 0x145   : > { %1402 = vmatpush.bf16.msra.mxu1 %v2221_v38 }
 0x146   : > { %1430 = vmatpush.bf16.msra.mxu3 %v2237_v40 }
 0x147   : > { %1417 = vmatpush.bf16.msra.mxu2 %v2228_v19 }
 0x148   : > { %1165 = vmatpush.bf16.msra.mxu0 %v2208_v13 }
 0x149   : > { %1403 = vmatpush.bf16.msra.mxu1 %v2220_v41 }
 0x14b   : > { %1418 = vmatpush.bf16.msra.mxu2 %v2227_v39 }
 0x14c   : > { %1166 = vmatpush.bf16.msra.mxu0 %v2207_v14 }
 0x14d   : > { %1404 = vmatpush.bf16.msra.mxu1 %v2219_v44 }
 0x14f   : > { %1419 = vmatpush.bf16.msra.mxu2 %v2226_v42 }
 0x153   : > { %1420 = vmatpush.bf16.msra.mxu2 %v2225_v45 }
 0x1bf   : > { %v807_v46 = vpop.f32.mrf.mxu0 }
 0x1c0   : > { %v808_v47 = vadd.f32 %v2291_v43, %v807_v46  ;;  %v2235_v46 = vld [vmem:[#allocation3 + $0x220] sm:$0xff] }
 0x1c2   : > { %v812_v49 = vadd.f32 %v808_v47, %v2473_v34  ;;  %v2218_v47 = vld [vmem:[#allocation3 + $0x198] sm:$0xff] }
 0x1c3   : > { %1405 = vmatpush.bf16.msra.mxu1 %v2218_v47 }
 0x1c4   : > { %v2497_v50 = vmul.f32 %v812_v49, %v2493_v48  ;;  %v2224_v49 = vld [vmem:[#allocation3 + $0x1c8] sm:$0xff] }
 0x1c5   : > { %1421 = vmatpush.bf16.msra.mxu2 %v2224_v49  ;;  %v2250_v49 = vld [vmem:[%s2585_s8 + $0x18] sm:$0xff] }
 0x1c6   : > { %818 = vst [vmem:[#allocation2 + $0x8] sm:$0xff] %v2497_v50  ;;  %v816_v56 = vpack.c.bf16 %v2497_v50, %v2497_v50 }
 0x1c7   : > { %v809_v51 = vpop.f32.mrf.mxu0 }
 0x1c8   : > { %v810_v52 = vadd.f32 %v2291_v43, %v809_v51  ;;  %v836_v57 = vunpack.c.l.b16 %v816_v56  ;;  %v2236_v43 = vld [vmem:[#allocation3 + $0x228] sm:$0xff]  ;;  %v2234_v51 = vld [vmem:[#allocation3 + $0x218] sm:$0xff]  ;;  %v2233_v56 = vld [vmem:[#allocation3 + $0x210] sm:$0xff] }
 0x1c9   : > { %1431 = vmatpush.bf16.msra.mxu3 %v2236_v43 }
 0x1ca   : > { %v813_v53 = vadd.f32 %v810_v52, %v2476_v36  ;;  %v2217_v52 = vld [vmem:[#allocation3 + $0x190] sm:$0xff] }
 0x1cb   : > { %1406 = vmatpush.bf16.msra.mxu1 %v2217_v52  ;;  %v2248_v52 = vld [vmem:[%s2585_s8 + $0x8] sm:$0xff] }
 0x1cc   : > { %v2504_v55 = vmul.f32 %v813_v53, %v2501_v54  ;;  %v2223_v53 = vld [vmem:[#allocation3 + $0x1c0] sm:$0xff] }
 0x1cd   : > { %v820_v59 = vld [vmem:[#allocation2 + $0x6] sm:$0xff]  ;;  %1432 = vmatpush.bf16.msra.mxu3 %v2235_v46  ;;  %1422 = vmatpush.bf16.msra.mxu2 %v2223_v53 }
 0x1ce   : > { %819 = vst [vmem:[#allocation2 + $0x10] sm:$0xff] %v2504_v55  ;;  %v817_v34 = vpack.c.bf16 %v2504_v55, %v2504_v55  ;;  %v822_v61 = vpack.c.bf16 %v820_v59, %v820_v59  ;;  %v2231_v59 = vld [vmem:[#allocation3 + $0x200] sm:$0xff] }
 0x1cf   : > { %v2247_v53 = vld [vmem:[%s2585_s8] sm:$0xff] }
 0x1d0   : > { %v837_v58 = vunpack.c.l.b16 %v817_v34  ;;  %v830_v3 = vunpack.c.l.b16 %v822_v61  ;;  %v2216_v34 = vld [vmem:[#allocation3 + $0x188] sm:$0xff]  ;;  %v2246_v61 = vld [vmem:[#allocation5 + $0xb8] sm:$0xff] }
 0x1d1   : > { %1433 = vmatpush.bf16.msra.mxu3 %v2234_v51  ;;  %1407 = vmatpush.bf16.msra.mxu1 %v2216_v34  ;;  %v2249_v51 = vld [vmem:[%s2585_s8 + $0x10] sm:$0xff]  ;;  %v2295_v34 = vld [vmem:[%s2584_s7 + $0x2] ss:$0 sm:$0xff] }
 0x1d2   : > { %v838_v60 = vpack.c.b16 %v837_v58, %v836_v57  ;;  %v2232_v57 = vld [vmem:[#allocation3 + $0x208] sm:$0xff]  ;;  %v2215_v58 = vld [vmem:[#allocation3 + $0x180] sm:$0xff]  ;;  %1516 = vmatpush.bf16.msrb.mxu0 %v2246_v61 }
 0x1d4   : > { %1066 = vmatmul.bf16.vlgmr.msrb.gmra.mxu2 %v838_v60  ;;  %v2293_v60 = vld [vmem:[%s2584_s7 + $0x1] ss:$0 sm:$0xff] }
 0x1d5   : > { %v821_v36 = vld [vmem:[#allocation2 + $0xe] sm:$0xff]  ;;  %1434 = vmatpush.bf16.msra.mxu3 %v2233_v56  ;;  %1408 = vmatpush.bf16.msra.mxu1 %v2215_v58 }
 0x1d6   : > { %v824_v62 = vld [vmem:[#allocation2 + $0xa] sm:$0xff]  ;;  %v825_v63 = vld [vmem:[#allocation2 + $0x12] sm:$0xff]  ;;  %v823_v0 = vpack.c.bf16 %v821_v36, %v821_v36 }
 0x1d7   : > { %v826_v1 = vpack.c.bf16 %v824_v62, %v824_v62  ;;  %v827_v2 = vpack.c.bf16 %v825_v63, %v825_v63  ;;  %v2245_v36 = vld [vmem:[#allocation5 + $0xb0] sm:$0xff] }
 0x1d8   : > { %v831_v4 = vunpack.c.l.b16 %v823_v0  ;;  %1517 = vmatpush.bf16.msrb.mxu0 %v2245_v36 }
 0x1d9   : > { %v842_v5 = vunpack.c.l.b16 %v826_v1  ;;  %v843_v6 = vunpack.c.l.b16 %v827_v2  ;;  %1435 = vmatpush.bf16.msra.mxu3 %v2232_v57 }
 0x1da   : > { %v832_v7 = vpack.c.b16 %v831_v4, %v830_v3 }
 0x1db   : > { %v844_v8 = vpack.c.b16 %v843_v6, %v842_v5 }
 0x1dc   : > { %1052 = vmatmul.bf16.vlgmr.msrb.gmra.mxu1 %v832_v7 }
 0x1dd   : > { %1080 = vmatmul.bf16.vlgmr.msrb.gmra.mxu3 %v844_v8 }
 0x1de   : > { %1436 = vmatpush.bf16.msra.mxu3 %v2231_v59 }
 0x257   : > { %v1067_v21 = vpop.f32.mrf.mxu2 }
 0x259   : > { %v1053_v20 = vpop.f32.mrf.mxu1 }
 0x25a   : > { %v1054_v24 = vadd.f32 %v2292_v22, %v1053_v20  ;;  %v2244_v20 = vld [vmem:[#allocation5 + $0xa8] sm:$0xff] }
 0x25b   : > { %1518 = vmatpush.bf16.msrb.mxu0 %v2244_v20 }
 0x25c   : > { %v1068_v27 = vadd.f32 %v1067_v21, %v1054_v24  ;;  %v2243_v21 = vld [vmem:[#allocation5 + $0xa0] sm:$0xff]  ;;  %v2240_v24 = vld [vmem:[#allocation5 + $0x88] sm:$0xff] }
 0x25f   : > { %v1069_v28 = vpop.f32.mrf.mxu2  ;;  %1519 = vmatpush.bf16.msrb.mxu0 %v2243_v21 }
 0x260   : > { %v1081_v23 = vpop.f32.mrf.mxu3 }
 0x261   : > { %v1055_v25 = vpop.f32.mrf.mxu1  ;;  %v1082_v29 = vadd.f32 %v1081_v23, %v1068_v27  ;;  %v2241_v23 = vld [vmem:[#allocation5 + $0x90] sm:$0xff] }
 0x262   : > { %v1056_v26 = vadd.f32 %v2292_v22, %v1055_v25  ;;  %v2242_v22 = vld [vmem:[#allocation5 + $0x98] sm:$0xff]  ;;  %v2239_v25 = vld [vmem:[#allocation5 + $0x80] sm:$0xff]  ;;  %v2253_v27 = vld [vmem:[%s2585_s8 + $0x30] sm:$0xff] }
 0x263   : > { %v1086_v33 = vmax.f32 %v1082_v29, 0.0  ;;  %1520 = vmatpush.bf16.msrb.mxu0 %v2242_v22  ;;  %v2251_v29 = vld [vmem:[%s2585_s8 + $0x20] sm:$0xff] }
 0x264   : > { %v1070_v30 = vadd.f32 %v1069_v28, %v1056_v26  ;;  %v2254_v26 = vld [vmem:[%s2585_s8 + $0x38] sm:$0xff]  ;;  %v2252_v28 = vld [vmem:[%s2585_s8 + $0x28] sm:$0xff] }
 0x265   : > { %1603 = vmatpush.bf16.msrb.mxu1 %v2254_v26 }
 0x267   : > { %1521 = vmatpush.bf16.msrb.mxu0 %v2241_v23 }
 0x268   : > { %v1083_v31 = vpop.f32.mrf.mxu3 }
 0x269   : > { %v1084_v32 = vadd.f32 %v1083_v31, %v1070_v30  ;;  %1604 = vmatpush.bf16.msrb.mxu1 %v2253_v27 }
 0x26b   : > { %v1087_v35 = vmax.f32 %v1084_v32, 0.0  ;;  %1522 = vmatpush.bf16.msrb.mxu0 %v2240_v24  ;;  %v2294_v32 = vld [vmem:[%s2582_s5 + $0x2] ss:$0 sm:$0xff] }
 0x26d   : > { %v1088_v37 = vpack.c.bf16 %v1087_v35, %v1086_v33  ;;  %1605 = vmatpush.bf16.msrb.mxu1 %v2252_v28 }
 0x26f   : > { %1167 = vmatmul.bf16.vlgmr.msra.gmra.mxu0 %v1088_v37 }
 0x270   : > { %1523 = vmatpush.bf16.msrb.mxu0 %v2239_v25 }
 0x271   : > { %1606 = vmatpush.bf16.msrb.mxu1 %v2251_v29 }
 0x275   : > { %1607 = vmatpush.bf16.msrb.mxu1 %v2250_v49 }
 0x279   : > { %1608 = vmatpush.bf16.msrb.mxu1 %v2249_v51 }
 0x27d   : > { %1609 = vmatpush.bf16.msrb.mxu1 %v2248_v52 }
 0x281   : > { %1610 = vmatpush.bf16.msrb.mxu1 %v2247_v53 }
 0x2ec   : > { %v1168_v62 = vpop.f32.mrf.mxu0 }
 0x2ed   : > { %v1169_v63 = vadd.f32 %v2293_v60, %v1168_v62 }
 0x2ef   : > { %v1173_v0 = vadd.f32 %v1169_v63, %v2497_v50 }
 0x2f1   : > { %v2519_v1 = vmul.f32 %v1173_v0, %v2493_v48  ;;  %v2296_v0 = vld [vmem:[%s2586_s9] ss:$0 sm:$0xff] }
 0x2f3   : > { %1179 = vst [vmem:[#allocation2 + $0x8] sm:$0xff] %v2519_v1  ;;  %v1177_v5 = vpack.c.bf16 %v2519_v1, %v2519_v1 }
 0x2f4   : > { %v1170_v2 = vpop.f32.mrf.mxu0 }
 0x2f5   : > { %v1171_v3 = vadd.f32 %v2293_v60, %v1170_v2  ;;  %v1195_v50 = vunpack.c.l.b16 %v1177_v5 }
 0x2f7   : > { %v1174_v4 = vadd.f32 %v1171_v3, %v2504_v55 }
 0x2f9   : > { %v2526_v6 = vmul.f32 %v1174_v4, %v2501_v54 }
 0x2fa   : > { %v1181_v9 = vld [vmem:[#allocation2 + $0x4] sm:$0xff] }
 0x2fb   : > { %v1178_v7 = vpack.c.bf16 %v2526_v6, %v2526_v6  ;;  %1180 = vst [vmem:[#allocation2 + $0x10] sm:$0xff] %v2526_v6  ;;  %v1183_v11 = vpack.c.bf16 %v1181_v9, %v1181_v9 }
 0x2fd   : > { %v1196_v8 = vunpack.c.l.b16 %v1178_v7  ;;  %v1189_v15 = vunpack.c.l.b16 %v1183_v11 }
 0x2ff   : > { %v1197_v10 = vpack.c.b16 %v1196_v8, %v1195_v50 }
 0x301   : > { %1423 = vmatmul.bf16.vlgmr.msra.gmra.mxu2 %v1197_v10 }
 0x302   : > { %v1182_v12 = vld [vmem:[#allocation2 + $0xc] sm:$0xff]  ;;  %v1185_v13 = vld [vmem:[#allocation2 + $0x14] sm:$0xff] }
 0x303   : > { %v1184_v55 = vpack.c.bf16 %v1182_v12, %v1182_v12  ;;  %v1186_v14 = vpack.c.bf16 %v1185_v13, %v1185_v13 }
 0x305   : > { %v1190_v16 = vunpack.c.l.b16 %v1184_v55  ;;  %v1200_v17 = vunpack.c.l.b16 %v1186_v14 }
 0x307   : > { %v1191_v18 = vpack.c.b16 %v1190_v16, %v1189_v15  ;;  %v1201_v19 = vpack.c.b16 %v1200_v17, %v1190_v16 }
 0x309   : > { %1409 = vmatmul.bf16.vlgmr.msra.gmra.mxu1 %v1191_v18  ;;  %1437 = vmatmul.bf16.vlgmr.msra.gmra.mxu3 %v1201_v19 }
 0x384   : > { %v1424_v31 = vpop.f32.mrf.mxu2 }
 0x386   : > { %v1410_v30 = vpop.f32.mrf.mxu1 }
 0x387   : > { %v1411_v35 = vadd.f32 %v2294_v32, %v1410_v30 }
 0x389   : > { %v1425_v39 = vadd.f32 %v1424_v31, %v1411_v35 }
 0x38c   : > { %v1438_v33 = vpop.f32.mrf.mxu3  ;;  %v1426_v40 = vpop.f32.mrf.mxu2 }
 0x38d   : > { %v1439_v41 = vadd.f32 %v1438_v33, %v1425_v39 }
 0x38e   : > { %v1412_v37 = vpop.f32.mrf.mxu1 }
 0x38f   : > { %v1413_v38 = vadd.f32 %v2294_v32, %v1412_v37  ;;  %v1443_v45 = vmax.f32 %v1439_v41, 0.0 }
 0x391   : > { %v1427_v42 = vadd.f32 %v1426_v40, %v1413_v38 }
 0x394   : > { %v1440_v43 = vpop.f32.mrf.mxu3 }
 0x395   : > { %v1441_v44 = vadd.f32 %v1440_v43, %v1427_v42 }
 0x397   : > { %v1444_v46 = vmax.f32 %v1441_v44, 0.0 }
 0x399   : > { %v1445_v47 = vpack.c.bf16 %v1444_v46, %v1443_v45 }
 0x39b   : > { %1524 = vmatmul.bf16.vlgmr.msrb.gmra.mxu0 %v1445_v47 }
 0x418   : > { %v1525_v56 = vpop.f32.mrf.mxu0 }
 0x419   : > { %v1526_v57 = vadd.f32 %v2295_v34, %v1525_v56 }
 0x41b   : > { %v1530_v59 = vadd.f32 %v1526_v57, %v2519_v1 }
 0x41d   : > { %v1532_v36 = vmul.f32 %v1530_v59, %v2493_v48 }
 0x420   : > { %v1527_v58 = vpop.f32.mrf.mxu0 }
 0x421   : > { %v1528_v60 = vadd.f32 %v2295_v34, %v1527_v58 }
 0x423   : > { %v1531_v61 = vadd.f32 %v1528_v60, %v2526_v6 }
 0x425   : > { %v1533_v62 = vmul.f32 %v1531_v61, %v2501_v54 }
 0x427   : > { %v1534_v63 = vpack.c.bf16 %v1533_v62, %v1532_v36 }
 0x429   : > { %1611 = vmatmul.bf16.vlgmr.msrb.gmra.mxu1 %v1534_v63 }
 0x4a6   : > { %v1612_v2 = vpop.f32.mrf.mxu1 }
 0x4a7   : > { %v1613_v3 = vadd.f32 %v2296_v0, %v1612_v2 }
 0x4a9   : > { %v1617_v1 = vmul.f32 %v1613_v3, %v2493_v48 }
 0x4ab   : > { %1619 = vst [vmem:[%s413_s16] sm:$0xff] %v1617_v1 }
 0x4ae   : > { %v1614_v4 = vpop.f32.mrf.mxu1 }
 0x4af   : > { %v1615_v5 = vadd.f32 %v2296_v0, %v1614_v4 }
 0x4b1   : > { %v1618_v6 = vmul.f32 %v1615_v5, %v2501_v54 }
 0x4b3   : > { %1620 = vst [vmem:[%s413_s16 + $0x8] sm:$0xff] %v1618_v6 }
 0x4b4 PF: > { %s22_s13 = sadd.s32 1, %s2371_s13  }
 0x4b5   : > { %p19_p7 = scmp.ge.s32.totalorder %s22_s13, 4  }
 0x4b7   :  { %21 = sbr.rel (!%p19_p7) target bundleno = 2 (0x2), region = 110 }
 0x4bc   :  { %1642 = vsyncpa [#allocation4], 1 }
 0x4bd   :  { %1644 = vsyncpa [#allocation4 + $0x1], 1 }
 0x4be   :  { %1645 = vsyncpa [#allocation6], 1 }

</bundles_post_ra>
